<compile_context>
chip_gen: v6e
topology: v6e:2x2x1
jax: 0.10.0
libtpu: 0.0.40
codegen_flags: <defaults>
</compile_context>

<pallas_src>
import functools
import math

import jax
import jax.numpy as jnp
from jax.experimental import pallas as pl
from jax.experimental.pallas import tpu as pltpu


# ---------------------------------------------------------------------------
# Tiling helpers
# ---------------------------------------------------------------------------
def _round_up(x, m):
    return ((x + m - 1) // m) * m


def _sublane_align(dtype):
    """Rows per sublane-packed vreg: 8 for f32, 16 for bf16, 32 for int8/fp8."""
    return max(8, 32 // jnp.dtype(dtype).itemsize)


def _pick_tile(dim, target, align):
    """Largest `align`-multiple <= target that divides `dim`, else the full dim."""
    if dim <= target:
        return dim
    t = (target // align) * align
    while t >= align:
        if dim % t == 0:
            return t
        t -= align
    return dim  # full dim is always a legal block


def _vmem_caps():
    """(physical VMEM bytes, per-call tile budget).  Falls back to v7x floor."""
    cap = 64 * 1024 * 1024
    try:
        info = pltpu.get_tpu_info()
        cap = int(getattr(info, "vmem_capacity_bytes", cap)) or cap
    except Exception:
        pass
    tile_budget = max(int(cap * 0.55), 24 * 1024 * 1024)
    return cap, tile_budget


def _vmem_limit(cap, usage_bytes):
    limit = usage_bytes + (16 << 20)
    limit = min(limit, int(cap * 0.85))
    return max(limit, 32 << 20)


# ---------------------------------------------------------------------------
# Stage 1: XW[p] = x @ W[p]   (hoisted out of the per-output-tile reduction)
# ---------------------------------------------------------------------------
def _xw_kernel(x_ref, w_ref, xw_ref):
    xw_ref[...] = jnp.dot(
        x_ref[...], w_ref[...], preferred_element_type=jnp.float32
    ).astype(xw_ref.dtype)


def _compute_xw(x, weight, compute_dtype):
    P, f_in_p, f_out_p = weight.shape
    N_p = x.shape[0]
    itm = jnp.dtype(compute_dtype).itemsize
    sub = _sublane_align(compute_dtype)
    cap, budget = _vmem_caps()

    tm = _pick_tile(N_p, 512, sub)
    tn = _pick_tile(f_out_p, 512, 128)

    def usage(tm_, tn_):
        # double-buffered x tile + W tile + output tile
        return 2 * tm_ * f_in_p * itm + 2 * f_in_p * tn_ * itm + 2 * tm_ * tn_ * itm

    while usage(tm, tn) > budget:
        if tn > 256:
            tn = _pick_tile(f_out_p, tn // 2, 128)
        elif tm > 128:
            tm = _pick_tile(N_p, tm // 2, sub)
        else:
            break
    # TODO(synk): tile f_in as a reduction axis if f_in_p*(tm+tn) ever nears VMEM.

    flops = 2 * P * N_p * f_in_p * f_out_p
    bytes_accessed = (
        P * N_p * f_in_p + P * f_in_p * f_out_p + P * N_p * f_out_p
    ) * itm

    return pl.pallas_call(
        _xw_kernel,
        out_shape=jax.ShapeDtypeStruct((P, N_p, f_out_p), compute_dtype),
        grid_spec=pltpu.PrefetchScalarGridSpec(
            num_scalar_prefetch=0,
            grid=(P, N_p // tm, f_out_p // tn),
            in_specs=[
                pl.BlockSpec((tm, f_in_p), lambda p, i, j: (i, 0)),        # x rows
                pl.BlockSpec((None, f_in_p, tn), lambda p, i, j: (p, 0, j)),  # W[p] col tile
            ],
            out_specs=pl.BlockSpec((None, tm, tn), lambda p, i, j: (p, i, j)),
        ),
        compiler_params=pltpu.CompilerParams(
            dimension_semantics=("parallel", "parallel", "parallel"),
            vmem_limit_bytes=_vmem_limit(cap, usage(tm, tn)),
        ),
        cost_estimate=pl.CostEstimate(
            flops=flops, transcendentals=0, bytes_accessed=bytes_accessed
        ),
    )(x, weight)


# ---------------------------------------------------------------------------
# Stage 2: out = sum over (p, k-tiles) of A[p] @ XW[p]
# ---------------------------------------------------------------------------
def _agg_kernel_tiled(a_ref, xw_ref, o_ref):
    p = pl.program_id(2)
    k = pl.program_id(3)

    @pl.when((p == 0) & (k == 0))
    def _():
        o_ref[...] = jnp.zeros_like(o_ref)

    # f32 accumulation directly into the resident f32 output block.
    o_ref[...] += jnp.dot(a_ref[...], xw_ref[...], preferred_element_type=jnp.float32)


def _agg_kernel_resident(a_ref, xw_ref, o_ref, *, tk, tn):
    # xw_ref is the whole (P, N_p, f_out_p) array, resident in VMEM.
    j = pl.program_id(1)
    p = pl.program_id(2)
    k = pl.program_id(3)

    @pl.when((p == 0) & (k == 0))
    def _():
        o_ref[...] = jnp.zeros_like(o_ref)

    k_off = pl.multiple_of(k * tk, tk)
    j_off = pl.multiple_of(j * tn, tn)
    xw_tile = xw_ref[p, pl.ds(k_off, tk), pl.ds(j_off, tn)]
    o_ref[...] += jnp.dot(a_ref[...], xw_tile, preferred_element_type=jnp.float32)


def _agg_tiles(N_p, f_out_p, itm, sub, budget, xw_tiled):
    tm = _pick_tile(N_p, 1024, sub)
    tk = _pick_tile(N_p, 2048, 128)
    tn = _pick_tile(f_out_p, 2048, 128)

    def usage(tm_, tk_, tn_):
        u = 2 * tm_ * tk_ * itm + tm_ * tn_ * 4  # A double-buffer + resident out
        if xw_tiled:
            u += 2 * tk_ * tn_ * itm             # XW double-buffer
        return u

    while usage(tm, tk, tn) > budget:
        if tk > 256:
            tk = _pick_tile(N_p, tk // 2, 128)
        elif tn > 256:
            tn = _pick_tile(f_out_p, tn // 2, 128)
        elif tm > 128:
            tm = _pick_tile(N_p, tm // 2, sub)
        else:
            break
    return tm, tk, tn, usage(tm, tk, tn)


def _aggregate(poly, xw, xw_resident):
    P, N_p, _ = poly.shape
    f_out_p = xw.shape[-1]
    itm = jnp.dtype(poly.dtype).itemsize
    sub = _sublane_align(poly.dtype)
    cap, budget = _vmem_caps()

    xw_bytes = math.prod(xw.shape) * itm
    if xw_resident is None:
        # Keep XW fully VMEM-resident when it is clearly affordable.
        xw_resident = xw_bytes <= min(budget // 2, 24 << 20)

    if xw_resident:
        tile_budget = max(budget - xw_bytes, 8 << 20)
        tm, tk, tn, usage = _agg_tiles(N_p, f_out_p, itm, sub, tile_budget, False)
        usage += xw_bytes
        kernel = functools.partial(_agg_kernel_resident, tk=tk, tn=tn)
        xw_spec = pl.BlockSpec(memory_space=pltpu.MemorySpace.VMEM)
    else:
        tm, tk, tn, usage = _agg_tiles(N_p, f_out_p, itm, sub, budget, True)
        kernel = _agg_kernel_tiled
        xw_spec = pl.BlockSpec((None, tk, tn), lambda i, j, p, k: (p, k, j))

    flops = 2 * P * N_p * N_p * f_out_p
    bytes_accessed = (P * N_p * N_p + P * N_p * f_out_p) * itm + N_p * f_out_p * 4

    return pl.pallas_call(
        kernel,
        out_shape=jax.ShapeDtypeStruct((N_p, f_out_p), jnp.float32),
        grid_spec=pltpu.PrefetchScalarGridSpec(
            num_scalar_prefetch=0,
            grid=(N_p // tm, f_out_p // tn, P, N_p // tk),
            in_specs=[
                pl.BlockSpec((None, tm, tk), lambda i, j, p, k: (p, i, k)),  # A tile
                xw_spec,                                                     # XW
            ],
            out_specs=pl.BlockSpec((tm, tn), lambda i, j, p, k: (i, j)),
        ),
        compiler_params=pltpu.CompilerParams(
            dimension_semantics=("parallel", "parallel", "arbitrary", "arbitrary"),
            vmem_limit_bytes=_vmem_limit(cap, usage),
        ),
        cost_estimate=pl.CostEstimate(
            flops=flops, transcendentals=0, bytes_accessed=bytes_accessed
        ),
    )(poly, xw)


# ---------------------------------------------------------------------------
# Public wrapper
# ---------------------------------------------------------------------------
@functools.partial(jax.jit, static_argnames=("compute_dtype", "xw_resident"))
def poly_graph_convolution(x, poly, weight, compute_dtype=jnp.bfloat16,
                           xw_resident=None):
    """x: (N, F_in), poly: (P, N, N), weight: (P, F_in, F_out) -> (N, F_out) f32."""
    P, N, N2 = poly.shape
    Pw, f_in, f_out = weight.shape
    assert N == N2 and x.shape == (N, f_in) and Pw == P

    # Pad every dimension to a 128 multiple: lane-dense stores, aligned tiles,
    # no full-dim fallback blocks for awkward N / f_in / f_out. Zero padding is
    # exact (zero rows/cols contribute zero); padding is sliced off at the end.
    N_p = _round_up(N, 128)
    f_in_p = _round_up(f_in, 128)
    f_out_p = _round_up(f_out, 128)

    x_c = x.astype(compute_dtype)
    w_c = weight.astype(compute_dtype)
    a_c = poly.astype(compute_dtype)
    if (N_p, f_in_p) != (N, f_in):
        x_c = jnp.pad(x_c, ((0, N_p - N), (0, f_in_p - f_in)))
    if (f_in_p, f_out_p) != (f_in, f_out):
        w_c = jnp.pad(w_c, ((0, 0), (0, f_in_p - f_in), (0, f_out_p - f_out)))
    if N_p != N:
        a_c = jnp.pad(a_c, ((0, 0), (0, N_p - N), (0, N_p - N)))

    xw = _compute_xw(x_c, w_c, compute_dtype)     # (P, N_p, f_out_p) compute_dtype
    out = _aggregate(a_c, xw, xw_resident)        # (N_p, f_out_p) f32
    return out[:N, :f_out]


def init_weight(key, adj_pow, in_features, out_features):
    # kaiming_normal_(mode='fan_in', nonlinearity='relu') on a 3-D tensor:
    # fan_in = size(1) * prod(size(2:)) = in_features * out_features,
    # gain = sqrt(2), std = gain / sqrt(fan_in)
    std = (2.0 / (in_features * out_features)) ** 0.5
    return std * jax.random.normal(
        key, (adj_pow, in_features, out_features), dtype=jnp.float32
    )


if __name__ == "__main__":
    key = jax.random.PRNGKey(0)
    k_x, k_a, k_w = jax.random.split(key, 3)

    ADJ_POW = 3     # number of adjacency-polynomial terms
    N = 16          # number of graph nodes
    F_IN = 32       # in_features
    F_OUT = 32      # out_features

    x = jax.random.normal(k_x, (N, F_IN), dtype=jnp.float32)
    poly = jax.random.normal(k_a, (ADJ_POW, N, N), dtype=jnp.float32)
    weight = init_weight(k_w, ADJ_POW, F_IN, F_OUT)

    # Pure-JAX reference (same semantics as the PyTorch loop).
    ref = jnp.zeros((N, F_OUT), jnp.float32)
    for p in range(ADJ_POW):
        ref = ref + poly[p] @ (x @ weight[p])

    # f32 compute, streamed (tiled) XW: tight check of the tiled stage-2 kernel.
    out_tiled = jax.block_until_ready(
        poly_graph_convolution(x, poly, weight, compute_dtype=jnp.float32,
                               xw_resident=False)
    )
    assert out_tiled.shape == (N, F_OUT)
    assert jnp.allclose(out_tiled, ref, atol=1e-4, rtol=1e-4), "f32 tiled mismatch"

    # f32 compute, VMEM-resident XW: tight check of the resident stage-2 kernel.
    out_res = jax.block_until_ready(
        poly_graph_convolution(x, poly, weight, compute_dtype=jnp.float32,
                               xw_resident=True)
    )
    assert jnp.allclose(out_res, ref, atol=1e-4, rtol=1e-4), "f32 resident mismatch"

    # bf16 production default (auto residency): loose tolerance.
    out_bf16 = jax.block_until_ready(poly_graph_convolution(x, poly, weight))
    assert jnp.allclose(out_bf16, ref, atol=1e-1, rtol=1e-1), "bf16 mismatch"

    print("KERNEL_OK")
</pallas_src>

<mosaic_0001>
module attributes {stable_mosaic.version = 11 : i64} {
  func.func @_xw_kernel(%arg0: i32, %arg1: i32, %arg2: i32, %arg3: memref<128x128xf32, #tpu.memory_space<vmem>>, %arg4: memref<1x128x128xf32, #tpu.memory_space<vmem>>, %arg5: memref<1x128x128xf32, #tpu.memory_space<vmem>>) attributes {dimension_semantics = [#tpu.dimension_semantics<parallel>, #tpu.dimension_semantics<parallel>, #tpu.dimension_semantics<parallel>], iteration_bounds = array<i64: 3, 1, 1>, scalar_prefetch = 0 : i64, scratch_operands = 0 : i64, tpu.core_type = #tpu.core_type<tc>, window_params = [{transform_indices = @transform_0, window_bounds = array<i64: 128, 128>}, {transform_indices = @transform_1, window_bounds = array<i64: 1, 128, 128>}, {transform_indices = @transform_2, window_bounds = array<i64: 1, 128, 128>}]} {
    %c0 = arith.constant 0 : index
    %c0_0 = arith.constant 0 : index
    %0 = vector.load %arg3[%c0, %c0_0] : memref<128x128xf32, #tpu.memory_space<vmem>>, vector<128x128xf32>
    %c0_1 = arith.constant 0 : index
    %c0_2 = arith.constant 0 : index
    %c0_3 = arith.constant 0 : index
    %1 = vector.load %arg4[%c0_1, %c0_2, %c0_3] : memref<1x128x128xf32, #tpu.memory_space<vmem>>, vector<1x128x128xf32>
    %2 = vector.shape_cast %1 : vector<1x128x128xf32> to vector<128x128xf32>
    %cst = arith.constant dense<0.000000e+00> : vector<128x128xf32>
    %3 = tpu.matmul %0, %2, %cst {dimension_numbers = #tpu.dot_dimension_numbers<[1], [0], [0], [1], [0, 0, 1, 1], [], []>} : vector<128x128xf32>, vector<128x128xf32>, vector<128x128xf32> -> vector<128x128xf32>
    %c0_4 = arith.constant 0 : index
    %c0_5 = arith.constant 0 : index
    %c0_6 = arith.constant 0 : index
    %4 = vector.load %arg5[%c0_4, %c0_5, %c0_6] : memref<1x128x128xf32, #tpu.memory_space<vmem>>, vector<1x128x128xf32>
    %5 = vector.shape_cast %4 : vector<1x128x128xf32> to vector<128x128xf32>
    %6 = vector.shape_cast %3 : vector<128x128xf32> to vector<1x128x128xf32>
    tpu.vector_store %arg5[%c0_4, %c0_5, %c0_6], %6 {strides = array<i32>} : memref<1x128x128xf32, #tpu.memory_space<vmem>>, vector<1x128x128xf32>,
    return
  }
  func.func @transform_0(%arg0: i32, %arg1: i32, %arg2: i32) -> (i32, i32) {
    %c0_i32 = arith.constant 0 : i32
    %c0_i32_0 = arith.constant 0 : i32
    return %arg1, %c0_i32 : i32, i32
  }
  func.func @transform_1(%arg0: i32, %arg1: i32, %arg2: i32) -> (i32, i32, i32) {
    %c0_i32 = arith.constant 0 : i32
    %c0_i32_0 = arith.constant 0 : i32
    return %arg0, %c0_i32, %arg2 : i32, i32, i32
  }
  func.func @transform_2(%arg0: i32, %arg1: i32, %arg2: i32) -> (i32, i32, i32) {
    %c0_i32 = arith.constant 0 : i32
    return %arg0, %arg1, %arg2 : i32, i32, i32
  }
}

module attributes {stable_mosaic.version = 11 : i64} {
  func.func @_agg_kernel_tiled(%arg0: i32, %arg1: i32, %arg2: i32, %arg3: i32, %arg4: memref<1x128x128xf32, #tpu.memory_space<vmem>>, %arg5: memref<1x128x128xf32, #tpu.memory_space<vmem>>, %arg6: memref<128x128xf32, #tpu.memory_space<vmem>>) attributes {dimension_semantics = [#tpu.dimension_semantics<parallel>, #tpu.dimension_semantics<parallel>, #tpu.dimension_semantics<arbitrary>, #tpu.dimension_semantics<arbitrary>], iteration_bounds = array<i64: 1, 1, 3, 1>, scalar_prefetch = 0 : i64, scratch_operands = 0 : i64, tpu.core_type = #tpu.core_type<tc>, window_params = [{transform_indices = @transform_0, window_bounds = array<i64: 1, 128, 128>}, {transform_indices = @transform_1, window_bounds = array<i64: 1, 128, 128>}, {transform_indices = @transform_2, window_bounds = array<i64: 128, 128>}]} {
    %c0_i32 = arith.constant 0 : i32
    %0 = arith.cmpi eq, %arg2, %c0_i32 : i32
    %c0_i32_0 = arith.constant 0 : i32
    %1 = arith.cmpi eq, %arg3, %c0_i32_0 : i32
    %2 = arith.andi %0, %1 : i1
    %3 = arith.extui %2 : i1 to i32
    %c0_i32_1 = arith.constant 0 : i32
    %4 = arith.cmpi ne, %3, %c0_i32_1 : i32
    scf.if %4 {
      %cst_11 = arith.constant 0.000000e+00 : f32
      %13 = vector.broadcast %cst_11 : f32 to vector<128x128xf32>
      %c0_12 = arith.constant 0 : index
      %c0_13 = arith.constant 0 : index
      %14 = vector.load %arg6[%c0_12, %c0_13] : memref<128x128xf32, #tpu.memory_space<vmem>>, vector<128x128xf32>
      tpu.vector_store %arg6[%c0_12, %c0_13], %13 {strides = array<i32>} : memref<128x128xf32, #tpu.memory_space<vmem>>, vector<128x128xf32>,
    } else {
    }
    %c0 = arith.constant 0 : index
    %c0_2 = arith.constant 0 : index
    %5 = vector.load %arg6[%c0, %c0_2] : memref<128x128xf32, #tpu.memory_space<vmem>>, vector<128x128xf32>
    %c0_3 = arith.constant 0 : index
    %c0_4 = arith.constant 0 : index
    %c0_5 = arith.constant 0 : index
    %6 = vector.load %arg4[%c0_3, %c0_4, %c0_5] : memref<1x128x128xf32, #tpu.memory_space<vmem>>, vector<1x128x128xf32>
    %7 = vector.shape_cast %6 : vector<1x128x128xf32> to vector<128x128xf32>
    %c0_6 = arith.constant 0 : index
    %c0_7 = arith.constant 0 : index
    %c0_8 = arith.constant 0 : index
    %8 = vector.load %arg5[%c0_6, %c0_7, %c0_8] : memref<1x128x128xf32, #tpu.memory_space<vmem>>, vector<1x128x128xf32>
    %9 = vector.shape_cast %8 : vector<1x128x128xf32> to vector<128x128xf32>
    %cst = arith.constant dense<0.000000e+00> : vector<128x128xf32>
    %10 = tpu.matmul %7, %9, %cst {dimension_numbers = #tpu.dot_dimension_numbers<[1], [0], [0], [1], [0, 0, 1, 1], [], []>} : vector<128x128xf32>, vector<128x128xf32>, vector<128x128xf32> -> vector<128x128xf32>
    %11 = arith.addf %5, %10 : vector<128x128xf32>
    %c0_9 = arith.constant 0 : index
    %c0_10 = arith.constant 0 : index
    %12 = vector.load %arg6[%c0_9, %c0_10] : memref<128x128xf32, #tpu.memory_space<vmem>>, vector<128x128xf32>
    tpu.vector_store %arg6[%c0_9, %c0_10], %11 {strides = array<i32>} : memref<128x128xf32, #tpu.memory_space<vmem>>, vector<128x128xf32>,
    return
  }
  func.func @transform_0(%arg0: i32, %arg1: i32, %arg2: i32, %arg3: i32) -> (i32, i32, i32) {
    %c0_i32 = arith.constant 0 : i32
    return %arg2, %arg0, %arg3 : i32, i32, i32
  }
  func.func @transform_1(%arg0: i32, %arg1: i32, %arg2: i32, %arg3: i32) -> (i32, i32, i32) {
    %c0_i32 = arith.constant 0 : i32
    return %arg2, %arg3, %arg1 : i32, i32, i32
  }
  func.func @transform_2(%arg0: i32, %arg1: i32, %arg2: i32, %arg3: i32) -> (i32, i32) {
    %c0_i32 = arith.constant 0 : i32
    return %arg0, %arg1 : i32, i32
  }
}

</mosaic_0001>

<bundles_post_ra>
// kernel: poly_graph_convolution.2
= control target key start
LH: loop header
LB: loop body
LE: loop exit
PB: predicated region body
PF: predicated region fallthrough
CT: control target
= control target key end

     0   :  { %s720_s9 = smov 0   ;;  %s722_s10 = smov 0   ;;  %s844_s0 = inlined_call_operand.vmem [shape: f32[128,128], index: 0, kind: input, shape index: {}]   ;;  %s845_s1 = inlined_call_operand.vmem [shape: f32[3,128,128], index: 1, kind: input, shape index: {}]   ;;  %s846_s2 = inlined_call_operand.vmem [shape: f32[3,128,128], index: 2, kind: output, shape index: {}]  }
   0x1   :  { %s724_s11 = smov 0  }
   0x2 LB: > { %s31_s12 = sadd.s32 1, %s699_s10  ;;  %p528_p0 = scmp.ge.s32.totalorder %s703_s11, 1  ;;  %s703_s11 = sphi %s724_s11, %s12_s11   ;;  %s699_s10 = sphi %s722_s10, %s848_s10   ;;  %s695_s9 = sphi %s720_s9, %s847_s9  }
   0x3   : > { %p33_p1 = scmp.ge.s32.totalorder %s31_s12, 3  ;;  %p151_p2 = scmp.lt.s32.totalorder %s703_s11, 4 }
   0x5   : > { %s850_s12 = smov (%p33_p1, %s31_s12), 0  ;;  %p152_p3 = pnand %p528_p0, %p151_p2 }
   0x6   : > { %p194_p4 = scmp.lt.s32.totalorder (!%p152_p3), %s695_s9, 2 }
   0x7   : > { %155 = sbr.rel (%p152_p3) target bundleno = 256 (0x100), region = 28 }
   0xc   : > { %v215_v0 = vld [vmem:[%s844_s0] sm:$0xff]  ;;  %s852_s9 = smov (!%p194_p4, %s695_s9), 2  ;;  %v216_v18 = vld [vmem:[%s844_s0 + $0x8] sm:$0xff]  ;;  %v217_v20 = vld [vmem:[%s844_s0 + $0x10] sm:$0xff] }
   0xd   : > { %v223_v1 = vld [vmem:[%s844_s0 + $0x40] sm:$0xff]  ;;  %601 = vmatprep.mubr.f32.mxu0 %v215_v0  ;;  %s535_s17 = sshll.u32 %s852_s9, 7  ;;  %v224_v19 = vld [vmem:[%s844_s0 + $0x48] sm:$0xff]  ;;  %v225_v21 = vld [vmem:[%s844_s0 + $0x50] sm:$0xff] }
   0xe   : > { %613 = vmatprep.mubr.f32.mxu1 %v223_v1  ;;  %s752_s20 = scalar_lea.vmem %s845_s1, %s535_s17  ;;  %v218_v22 = vld [vmem:[%s844_s0 + $0x18] sm:$0xff]  ;;  %v219_v24 = vld [vmem:[%s844_s0 + $0x20] sm:$0xff]  ;;  %v220_v26 = vld [vmem:[%s844_s0 + $0x28] sm:$0xff]  ;;  %s817_s28 = scalar_lea.vmem %s846_s2, %s535_s17 }
   0xf   : > { %v246_v2 = vld [vmem:[%s752_s20 + $0x78] sm:$0xff]  ;;  %v245_v3 = vld [vmem:[%s752_s20 + $0x70] sm:$0xff]  ;;  %v244_v4 = vld [vmem:[%s752_s20 + $0x68] sm:$0xff] }
  0x10   : > { %569 = vmatprep.subr.mxu0 %v246_v2  ;;  %625 = vmatprep.subr.mxu1 %v246_v2  ;;  %v243_v5 = vld [vmem:[%s752_s20 + $0x60] sm:$0xff]  ;;  %v242_v6 = vld [vmem:[%s752_s20 + $0x58] sm:$0xff]  ;;  %v241_v7 = vld [vmem:[%s752_s20 + $0x50] sm:$0xff] }
  0x11   : > { %570 = vmatpush3.msra.mxu0 %v246_v2  ;;  %641 = vmatpush3.msra.mxu1 %v246_v2  ;;  %v240_v8 = vld [vmem:[%s752_s20 + $0x48] sm:$0xff]  ;;  %v239_v9 = vld [vmem:[%s752_s20 + $0x40] sm:$0xff]  ;;  %v238_v10 = vld [vmem:[%s752_s20 + $0x38] sm:$0xff] }
  0x12   : > { %571 = vmatprep.subr.mxu0 %v245_v3  ;;  %626 = vmatprep.subr.mxu1 %v245_v3  ;;  %v237_v11 = vld [vmem:[%s752_s20 + $0x30] sm:$0xff]  ;;  %v236_v12 = vld [vmem:[%s752_s20 + $0x28] sm:$0xff]  ;;  %v235_v13 = vld [vmem:[%s752_s20 + $0x20] sm:$0xff] }
  0x13   : > { %572 = vmatpush3.msra.mxu0 %v245_v3  ;;  %642 = vmatpush3.msra.mxu1 %v245_v3  ;;  %v234_v14 = vld [vmem:[%s752_s20 + $0x18] sm:$0xff]  ;;  %v233_v15 = vld [vmem:[%s752_s20 + $0x10] sm:$0xff]  ;;  %v232_v16 = vld [vmem:[%s752_s20 + $0x8] sm:$0xff] }
  0x14   : > { %573 = vmatprep.subr.mxu0 %v244_v4  ;;  %627 = vmatprep.subr.mxu1 %v244_v4  ;;  %v231_v17 = vld [vmem:[%s752_s20] sm:$0xff]  ;;  %v226_v23 = vld [vmem:[%s844_s0 + $0x58] sm:$0xff]  ;;  %v228_v27 = vld [vmem:[%s844_s0 + $0x68] sm:$0xff] }
  0x15   : > { %574 = vmatpush3.msra.mxu0 %v244_v4  ;;  %643 = vmatpush3.msra.mxu1 %v244_v4  ;;  %v227_v25 = vld [vmem:[%s844_s0 + $0x60] sm:$0xff]  ;;  %v221_v28 = vld [vmem:[%s844_s0 + $0x30] sm:$0xff]  ;;  %v222_v30 = vld [vmem:[%s844_s0 + $0x38] sm:$0xff] }
  0x16   : > { %575 = vmatprep.subr.mxu0 %v243_v5  ;;  %628 = vmatprep.subr.mxu1 %v243_v5  ;;  %v229_v29 = vld [vmem:[%s844_s0 + $0x70] sm:$0xff]  ;;  %v230_v31 = vld [vmem:[%s844_s0 + $0x78] sm:$0xff] }
  0x17   : > { %576 = vmatpush3.msra.mxu0 %v243_v5  ;;  %644 = vmatpush3.msra.mxu1 %v243_v5 }
  0x18   : > { %577 = vmatprep.subr.mxu0 %v242_v6  ;;  %629 = vmatprep.subr.mxu1 %v242_v6 }
  0x19   : > { %578 = vmatpush3.msra.mxu0 %v242_v6  ;;  %645 = vmatpush3.msra.mxu1 %v242_v6 }
  0x1a   : > { %579 = vmatprep.subr.mxu0 %v241_v7  ;;  %630 = vmatprep.subr.mxu1 %v241_v7 }
  0x1b   : > { %580 = vmatpush3.msra.mxu0 %v241_v7  ;;  %646 = vmatpush3.msra.mxu1 %v241_v7 }
  0x1c   : > { %581 = vmatprep.subr.mxu0 %v240_v8  ;;  %631 = vmatprep.subr.mxu1 %v240_v8 }
  0x1d   : > { %582 = vmatpush3.msra.mxu0 %v240_v8  ;;  %647 = vmatpush3.msra.mxu1 %v240_v8 }
  0x1e   : > { %583 = vmatprep.subr.mxu0 %v239_v9  ;;  %632 = vmatprep.subr.mxu1 %v239_v9 }
  0x1f   : > { %584 = vmatpush3.msra.mxu0 %v239_v9  ;;  %648 = vmatpush3.msra.mxu1 %v239_v9 }
  0x20   : > { %585 = vmatprep.subr.mxu0 %v238_v10  ;;  %633 = vmatprep.subr.mxu1 %v238_v10 }
  0x21   : > { %586 = vmatpush3.msra.mxu0 %v238_v10  ;;  %649 = vmatpush3.msra.mxu1 %v238_v10 }
  0x22   : > { %587 = vmatprep.subr.mxu0 %v237_v11  ;;  %634 = vmatprep.subr.mxu1 %v237_v11 }
  0x23   : > { %588 = vmatpush3.msra.mxu0 %v237_v11  ;;  %650 = vmatpush3.msra.mxu1 %v237_v11 }
  0x24   : > { %589 = vmatprep.subr.mxu0 %v236_v12  ;;  %635 = vmatprep.subr.mxu1 %v236_v12 }
  0x25   : > { %590 = vmatpush3.msra.mxu0 %v236_v12  ;;  %651 = vmatpush3.msra.mxu1 %v236_v12 }
  0x26   : > { %591 = vmatprep.subr.mxu0 %v235_v13  ;;  %636 = vmatprep.subr.mxu1 %v235_v13 }
  0x27   : > { %592 = vmatpush3.msra.mxu0 %v235_v13  ;;  %652 = vmatpush3.msra.mxu1 %v235_v13 }
  0x28   : > { %593 = vmatprep.subr.mxu0 %v234_v14  ;;  %637 = vmatprep.subr.mxu1 %v234_v14 }
  0x29   : > { %594 = vmatpush3.msra.mxu0 %v234_v14  ;;  %653 = vmatpush3.msra.mxu1 %v234_v14 }
  0x2a   : > { %595 = vmatprep.subr.mxu0 %v233_v15  ;;  %638 = vmatprep.subr.mxu1 %v233_v15 }
  0x2b   : > { %596 = vmatpush3.msra.mxu0 %v233_v15  ;;  %654 = vmatpush3.msra.mxu1 %v233_v15 }
  0x2c   : > { %597 = vmatprep.subr.mxu0 %v232_v16  ;;  %639 = vmatprep.subr.mxu1 %v232_v16 }
  0x2d   : > { %598 = vmatpush3.msra.mxu0 %v232_v16  ;;  %655 = vmatpush3.msra.mxu1 %v232_v16 }
  0x2e   : > { %599 = vmatprep.subr.mxu0 %v231_v17  ;;  %640 = vmatprep.subr.mxu1 %v231_v17 }
  0x2f   : > { %600 = vmatpush3.msra.mxu0 %v231_v17  ;;  %656 = vmatpush3.msra.mxu1 %v231_v17 }
  0x30   : > { %602 = vmatmul.mubr.f32.vlgmr.msra.gmra.mxu0 %v216_v18  ;;  %614 = vmatmul.mubr.f32.vlgmr.msra.gmra.mxu1 %v224_v19 }
  0x31   : > { %604 = vmatprep.mubr.f32.mxu0 %v217_v20  ;;  %616 = vmatprep.mubr.f32.mxu1 %v225_v21 }
  0x34   : > { %605 = vmatmul.mubr.f32.gmra.mxu0 %v218_v22  ;;  %617 = vmatmul.mubr.f32.gmra.mxu1 %v226_v23 }
  0x35   : > { %607 = vmatprep.mubr.f32.mxu0 %v219_v24  ;;  %619 = vmatprep.mubr.f32.mxu1 %v227_v25 }
  0x38   : > { %608 = vmatmul.mubr.f32.gmra.mxu0 %v220_v26  ;;  %620 = vmatmul.mubr.f32.gmra.mxu1 %v228_v27 }
  0x39   : > { %610 = vmatprep.mubr.f32.mxu0 %v221_v28  ;;  %622 = vmatprep.mubr.f32.mxu1 %v229_v29 }
  0x3c   : > { %611 = vmatmul.mubr.f32.gmra.mxu0 %v222_v30  ;;  %623 = vmatmul.mubr.f32.gmra.mxu1 %v230_v31 }
  0xf0   : > { %v603_v32 = vpop.f32.mrf.mxu0  ;;  %v615_v33 = vpop.f32.mrf.mxu1 }
  0xf1   : > { %393 = vst [vmem:[%s817_s28 + $0x8] sm:$0xff] %v603_v32  ;;  %401 = vst [vmem:[%s817_s28 + $0x48] sm:$0xff] %v615_v33 }
  0xf2   : > { %v313_v34 = vpop.f32.mrf.mxu0  ;;  %v353_v35 = vpop.f32.mrf.mxu1 }
  0xf3   : > { %392 = vst [vmem:[%s817_s28] sm:$0xff] %v313_v34  ;;  %400 = vst [vmem:[%s817_s28 + $0x40] sm:$0xff] %v353_v35 }
  0xf4   : > { %v606_v36 = vpop.f32.mrf.mxu0  ;;  %v618_v37 = vpop.f32.mrf.mxu1 }
  0xf5   : > { %395 = vst [vmem:[%s817_s28 + $0x18] sm:$0xff] %v606_v36  ;;  %403 = vst [vmem:[%s817_s28 + $0x58] sm:$0xff] %v618_v37 }
  0xf6   : > { %v323_v38 = vpop.f32.mrf.mxu0  ;;  %v363_v39 = vpop.f32.mrf.mxu1 }
  0xf7   : > { %394 = vst [vmem:[%s817_s28 + $0x10] sm:$0xff] %v323_v38  ;;  %402 = vst [vmem:[%s817_s28 + $0x50] sm:$0xff] %v363_v39 }
  0xf8   : > { %v609_v40 = vpop.f32.mrf.mxu0  ;;  %v621_v41 = vpop.f32.mrf.mxu1 }
  0xf9   : > { %397 = vst [vmem:[%s817_s28 + $0x28] sm:$0xff] %v609_v40  ;;  %405 = vst [vmem:[%s817_s28 + $0x68] sm:$0xff] %v621_v41 }
  0xfa   : > { %v333_v42 = vpop.f32.mrf.mxu0  ;;  %v373_v43 = vpop.f32.mrf.mxu1 }
  0xfb   : > { %396 = vst [vmem:[%s817_s28 + $0x20] sm:$0xff] %v333_v42  ;;  %404 = vst [vmem:[%s817_s28 + $0x60] sm:$0xff] %v373_v43 }
  0xfc   : > { %v612_v44 = vpop.f32.mrf.mxu0  ;;  %v624_v45 = vpop.f32.mrf.mxu1 }
  0xfd   : > { %399 = vst [vmem:[%s817_s28 + $0x38] sm:$0xff] %v612_v44  ;;  %407 = vst [vmem:[%s817_s28 + $0x78] sm:$0xff] %v624_v45 }
  0xfe   : > { %v343_v46 = vpop.f32.mrf.mxu0  ;;  %v383_v47 = vpop.f32.mrf.mxu1 }
  0xff   : > { %398 = vst [vmem:[%s817_s28 + $0x30] sm:$0xff] %v343_v46  ;;  %406 = vst [vmem:[%s817_s28 + $0x70] sm:$0xff] %v383_v47 }
 0x100 PF: > { %s12_s11 = sadd.s32 1, %s703_s11   ;;  %s847_s9 = smov %s699_s10 }
 0x101   : > { %p9_p5 = scmp.ge.s32.totalorder %s12_s11, 5   ;;  %s848_s10 = smov %s850_s12 }
 0x103   :  { %11 = sbr.rel (!%p9_p5) target bundleno = 2 (0x2), region = 61 }

// kernel: poly_graph_convolution.3
= control target key start
LH: loop header
LB: loop body
LE: loop exit
PB: predicated region body
PF: predicated region fallthrough
CT: control target
= control target key end

     0   :  { %s809_s9 = smov 0   ;;  %s811_s10 = smov 0   ;;  %s1022_s0 = inlined_call_operand.vmem [shape: f32[3,128,128], index: 0, kind: input, shape index: {}]   ;;  %s1023_s1 = inlined_call_operand.vmem [shape: f32[3,128,128], index: 1, kind: input, shape index: {}]   ;;  %s1024_s2 = inlined_call_operand.vmem [shape: f32[128,128], index: 2, kind: output, shape index: {}]  }
   0x1   :  { %s813_s11 = smov 0  }
   0x2 LB: > { %s30_s12 = sadd.s32 1, %s787_s10  ;;  %p611_p0 = scmp.ge.s32.totalorder %s791_s11, 1  ;;  %s791_s11 = sphi %s813_s11, %s12_s11   ;;  %s787_s10 = sphi %s811_s10, %s1026_s10   ;;  %s783_s9 = sphi %s809_s9, %s1025_s9  }
   0x3   : > { %p32_p1 = scmp.ge.s32.totalorder %s30_s12, 3  ;;  %p174_p2 = scmp.lt.s32.totalorder %s791_s11, 4 }
   0x5   : > { %s1028_s12 = smov (%p32_p1, %s30_s12), 0  ;;  %p175_p3 = pnand %p611_p0, %p174_p2 }
   0x6   : > { %p219_p4 = scmp.lt.s32.totalorder (!%p175_p3), %s783_s9, 2  ;;  %p253_p5 = scmp.eq.s32.totalorder (!%p175_p3), %s783_s9, 0 }
   0x7   : > { %178 = sbr.rel (%p175_p3) target bundleno = 265 (0x109), region = 28 }
   0xc   : > { %s1030_s9 = smov (!%p219_p4, %s783_s9), 2  ;;  %258 = sbr.rel (!%p253_p5) target bundleno = 21 (0x15), region = 32  ;;  %v793_v0 = vmov (%p253_p5), 0.0  }
   0xd   : > { %s621_s13 = sshll.u32 %s1030_s9, 7  ;;  %259 = vst [vmem:[%s1024_s2] sm:$0xff] (%p253_p5), %v793_v0  ;;  %260 = vst [vmem:[%s1024_s2 + $0x8] sm:$0xff] (%p253_p5), %v793_v0 }
   0xe   : > { %s830_s16 = scalar_lea.vmem %s1022_s0, %s621_s13  ;;  %s835_s19 = scalar_lea.vmem %s1023_s1, %s621_s13  ;;  %261 = vst [vmem:[%s1024_s2 + $0x10] sm:$0xff] (%p253_p5), %v793_v0  ;;  %262 = vst [vmem:[%s1024_s2 + $0x18] sm:$0xff] (%p253_p5), %v793_v0 }
   0xf   : > { %263 = vst [vmem:[%s1024_s2 + $0x20] sm:$0xff] (%p253_p5), %v793_v0  ;;  %264 = vst [vmem:[%s1024_s2 + $0x28] sm:$0xff] (%p253_p5), %v793_v0 }
  0x10   : > { %265 = vst [vmem:[%s1024_s2 + $0x30] sm:$0xff] (%p253_p5), %v793_v0  ;;  %266 = vst [vmem:[%s1024_s2 + $0x38] sm:$0xff] (%p253_p5), %v793_v0 }
  0x11   : > { %267 = vst [vmem:[%s1024_s2 + $0x40] sm:$0xff] %v793_v0  ;;  %268 = vst [vmem:[%s1024_s2 + $0x48] sm:$0xff] %v793_v0 }
  0x12   : > { %269 = vst [vmem:[%s1024_s2 + $0x50] sm:$0xff] %v793_v0  ;;  %270 = vst [vmem:[%s1024_s2 + $0x58] sm:$0xff] %v793_v0 }
  0x13   : > { %271 = vst [vmem:[%s1024_s2 + $0x60] sm:$0xff] %v793_v0  ;;  %272 = vst [vmem:[%s1024_s2 + $0x68] sm:$0xff] %v793_v0 }
  0x14   : > { %273 = vst [vmem:[%s1024_s2 + $0x70] sm:$0xff] %v793_v0  ;;  %274 = vst [vmem:[%s1024_s2 + $0x78] sm:$0xff] %v793_v0 }
  0x15 PF: > { %v322_v1 = vld [vmem:[%s835_s19 + $0x78] sm:$0xff]  ;;  %v321_v2 = vld [vmem:[%s835_s19 + $0x70] sm:$0xff]  ;;  %v320_v3 = vld [vmem:[%s835_s19 + $0x68] sm:$0xff] }
  0x16   : > { %656 = vmatprep.subr.mxu0 %v322_v1  ;;  %712 = vmatprep.subr.mxu1 %v322_v1  ;;  %v319_v4 = vld [vmem:[%s835_s19 + $0x60] sm:$0xff]  ;;  %v318_v5 = vld [vmem:[%s835_s19 + $0x58] sm:$0xff]  ;;  %v317_v6 = vld [vmem:[%s835_s19 + $0x50] sm:$0xff] }
  0x17   : > { %657 = vmatpush3.msra.mxu0 %v322_v1  ;;  %728 = vmatpush3.msra.mxu1 %v322_v1  ;;  %v316_v7 = vld [vmem:[%s835_s19 + $0x48] sm:$0xff]  ;;  %v315_v8 = vld [vmem:[%s835_s19 + $0x40] sm:$0xff]  ;;  %v314_v9 = vld [vmem:[%s835_s19 + $0x38] sm:$0xff] }
  0x18   : > { %658 = vmatprep.subr.mxu0 %v321_v2  ;;  %713 = vmatprep.subr.mxu1 %v321_v2  ;;  %v313_v10 = vld [vmem:[%s835_s19 + $0x30] sm:$0xff]  ;;  %v312_v11 = vld [vmem:[%s835_s19 + $0x28] sm:$0xff]  ;;  %v311_v12 = vld [vmem:[%s835_s19 + $0x20] sm:$0xff] }
  0x19   : > { %659 = vmatpush3.msra.mxu0 %v321_v2  ;;  %729 = vmatpush3.msra.mxu1 %v321_v2  ;;  %v310_v13 = vld [vmem:[%s835_s19 + $0x18] sm:$0xff]  ;;  %v309_v14 = vld [vmem:[%s835_s19 + $0x10] sm:$0xff]  ;;  %v308_v15 = vld [vmem:[%s835_s19 + $0x8] sm:$0xff] }
  0x1a   : > { %660 = vmatprep.subr.mxu0 %v320_v3  ;;  %714 = vmatprep.subr.mxu1 %v320_v3  ;;  %v307_v16 = vld [vmem:[%s835_s19] sm:$0xff]  ;;  %v292_v19 = vld [vmem:[%s830_s16 + $0x8] sm:$0xff]  ;;  %v293_v21 = vld [vmem:[%s830_s16 + $0x10] sm:$0xff] }
  0x1b   : > { %661 = vmatpush3.msra.mxu0 %v320_v3  ;;  %730 = vmatpush3.msra.mxu1 %v320_v3  ;;  %v291_v17 = vld [vmem:[%s830_s16] sm:$0xff]  ;;  %v300_v20 = vld [vmem:[%s830_s16 + $0x48] sm:$0xff]  ;;  %v301_v22 = vld [vmem:[%s830_s16 + $0x50] sm:$0xff] }
  0x1c   : > { %662 = vmatprep.subr.mxu0 %v319_v4  ;;  %715 = vmatprep.subr.mxu1 %v319_v4  ;;  %v299_v18 = vld [vmem:[%s830_s16 + $0x40] sm:$0xff]  ;;  %v294_v23 = vld [vmem:[%s830_s16 + $0x18] sm:$0xff]  ;;  %v296_v27 = vld [vmem:[%s830_s16 + $0x28] sm:$0xff] }
  0x1d   : > { %663 = vmatpush3.msra.mxu0 %v319_v4  ;;  %731 = vmatpush3.msra.mxu1 %v319_v4  ;;  %v302_v24 = vld [vmem:[%s830_s16 + $0x58] sm:$0xff]  ;;  %v295_v25 = vld [vmem:[%s830_s16 + $0x20] sm:$0xff]  ;;  %v304_v28 = vld [vmem:[%s830_s16 + $0x68] sm:$0xff] }
  0x1e   : > { %664 = vmatprep.subr.mxu0 %v318_v5  ;;  %716 = vmatprep.subr.mxu1 %v318_v5  ;;  %v303_v26 = vld [vmem:[%s830_s16 + $0x60] sm:$0xff]  ;;  %v297_v29 = vld [vmem:[%s830_s16 + $0x30] sm:$0xff]  ;;  %v298_v31 = vld [vmem:[%s830_s16 + $0x38] sm:$0xff] }
  0x1f   : > { %665 = vmatpush3.msra.mxu0 %v318_v5  ;;  %732 = vmatpush3.msra.mxu1 %v318_v5  ;;  %v305_v30 = vld [vmem:[%s830_s16 + $0x70] sm:$0xff]  ;;  %v306_v32 = vld [vmem:[%s830_s16 + $0x78] sm:$0xff]  ;;  %v276_v33 = vld [vmem:[%s1024_s2 + $0x8] sm:$0xff] }
  0x20   : > { %666 = vmatprep.subr.mxu0 %v317_v6  ;;  %717 = vmatprep.subr.mxu1 %v317_v6  ;;  %v284_v34 = vld [vmem:[%s1024_s2 + $0x48] sm:$0xff]  ;;  %v275_v37 = vld [vmem:[%s1024_s2] sm:$0xff]  ;;  %v278_v43 = vld [vmem:[%s1024_s2 + $0x18] sm:$0xff] }
  0x21   : > { %667 = vmatpush3.msra.mxu0 %v317_v6  ;;  %733 = vmatpush3.msra.mxu1 %v317_v6  ;;  %v283_v38 = vld [vmem:[%s1024_s2 + $0x40] sm:$0xff]  ;;  %v286_v44 = vld [vmem:[%s1024_s2 + $0x58] sm:$0xff]  ;;  %v277_v49 = vld [vmem:[%s1024_s2 + $0x10] sm:$0xff] }
  0x22   : > { %668 = vmatprep.subr.mxu0 %v316_v7  ;;  %718 = vmatprep.subr.mxu1 %v316_v7  ;;  %v285_v50 = vld [vmem:[%s1024_s2 + $0x50] sm:$0xff]  ;;  %v280_v55 = vld [vmem:[%s1024_s2 + $0x28] sm:$0xff]  ;;  %v279_v61 = vld [vmem:[%s1024_s2 + $0x20] sm:$0xff] }
  0x23   : > { %669 = vmatpush3.msra.mxu0 %v316_v7  ;;  %734 = vmatpush3.msra.mxu1 %v316_v7  ;;  %v288_v56 = vld [vmem:[%s1024_s2 + $0x68] sm:$0xff]  ;;  %v287_v62 = vld [vmem:[%s1024_s2 + $0x60] sm:$0xff]  ;;  %v282_v3 = vld [vmem:[%s1024_s2 + $0x38] sm:$0xff] }
  0x24   : > { %670 = vmatprep.subr.mxu0 %v315_v8  ;;  %719 = vmatprep.subr.mxu1 %v315_v8  ;;  %v290_v4 = vld [vmem:[%s1024_s2 + $0x78] sm:$0xff] }
  0x25   : > { %671 = vmatpush3.msra.mxu0 %v315_v8  ;;  %735 = vmatpush3.msra.mxu1 %v315_v8 }
  0x26   : > { %672 = vmatprep.subr.mxu0 %v314_v9  ;;  %720 = vmatprep.subr.mxu1 %v314_v9 }
  0x27   : > { %673 = vmatpush3.msra.mxu0 %v314_v9  ;;  %736 = vmatpush3.msra.mxu1 %v314_v9  ;;  %v281_v9 = vld [vmem:[%s1024_s2 + $0x30] sm:$0xff] }
  0x28   : > { %674 = vmatprep.subr.mxu0 %v313_v10  ;;  %721 = vmatprep.subr.mxu1 %v313_v10 }
  0x29   : > { %675 = vmatpush3.msra.mxu0 %v313_v10  ;;  %737 = vmatpush3.msra.mxu1 %v313_v10  ;;  %v289_v10 = vld [vmem:[%s1024_s2 + $0x70] sm:$0xff] }
  0x2a   : > { %676 = vmatprep.subr.mxu0 %v312_v11  ;;  %722 = vmatprep.subr.mxu1 %v312_v11 }
  0x2b   : > { %677 = vmatpush3.msra.mxu0 %v312_v11  ;;  %738 = vmatpush3.msra.mxu1 %v312_v11 }
  0x2c   : > { %678 = vmatprep.subr.mxu0 %v311_v12  ;;  %723 = vmatprep.subr.mxu1 %v311_v12 }
  0x2d   : > { %679 = vmatpush3.msra.mxu0 %v311_v12  ;;  %739 = vmatpush3.msra.mxu1 %v311_v12 }
  0x2e   : > { %680 = vmatprep.subr.mxu0 %v310_v13  ;;  %724 = vmatprep.subr.mxu1 %v310_v13 }
  0x2f   : > { %681 = vmatpush3.msra.mxu0 %v310_v13  ;;  %740 = vmatpush3.msra.mxu1 %v310_v13 }
  0x30   : > { %682 = vmatprep.subr.mxu0 %v309_v14  ;;  %725 = vmatprep.subr.mxu1 %v309_v14 }
  0x31   : > { %683 = vmatpush3.msra.mxu0 %v309_v14  ;;  %741 = vmatpush3.msra.mxu1 %v309_v14 }
  0x32   : > { %684 = vmatprep.subr.mxu0 %v308_v15  ;;  %726 = vmatprep.subr.mxu1 %v308_v15 }
  0x33   : > { %685 = vmatpush3.msra.mxu0 %v308_v15  ;;  %742 = vmatpush3.msra.mxu1 %v308_v15 }
  0x34   : > { %686 = vmatprep.subr.mxu0 %v307_v16  ;;  %727 = vmatprep.subr.mxu1 %v307_v16 }
  0x35   : > { %687 = vmatpush3.msra.mxu0 %v307_v16  ;;  %743 = vmatpush3.msra.mxu1 %v307_v16 }
  0x36   : > { %688 = vmatprep.mubr.f32.mxu0 %v291_v17  ;;  %700 = vmatprep.mubr.f32.mxu1 %v299_v18 }
  0x37   : > { %689 = vmatmul.mubr.f32.vlgmr.msra.gmra.mxu0 %v292_v19  ;;  %701 = vmatmul.mubr.f32.vlgmr.msra.gmra.mxu1 %v300_v20 }
  0x38   : > { %691 = vmatprep.mubr.f32.mxu0 %v293_v21  ;;  %703 = vmatprep.mubr.f32.mxu1 %v301_v22 }
  0x3b   : > { %692 = vmatmul.mubr.f32.gmra.mxu0 %v294_v23  ;;  %704 = vmatmul.mubr.f32.gmra.mxu1 %v302_v24 }
  0x3c   : > { %694 = vmatprep.mubr.f32.mxu0 %v295_v25  ;;  %706 = vmatprep.mubr.f32.mxu1 %v303_v26 }
  0x3f   : > { %695 = vmatmul.mubr.f32.gmra.mxu0 %v296_v27  ;;  %707 = vmatmul.mubr.f32.gmra.mxu1 %v304_v28 }
  0x40   : > { %697 = vmatprep.mubr.f32.mxu0 %v297_v29  ;;  %709 = vmatprep.mubr.f32.mxu1 %v305_v30 }
  0x43   : > { %698 = vmatmul.mubr.f32.gmra.mxu0 %v298_v31  ;;  %710 = vmatmul.mubr.f32.gmra.mxu1 %v306_v32 }
  0xf7   : > { %v690_v35 = vpop.f32.mrf.mxu0  ;;  %v702_v36 = vpop.f32.mrf.mxu1 }
  0xf8   : > { %v469_v39 = vadd.f32 %v690_v35, %v276_v33  ;;  %v477_v40 = vadd.f32 %v702_v36, %v284_v34 }
  0xf9   : > { %v389_v41 = vpop.f32.mrf.mxu0  ;;  %v429_v42 = vpop.f32.mrf.mxu1 }
  0xfa   : > { %485 = vst [vmem:[%s1024_s2 + $0x8] sm:$0xff] %v469_v39  ;;  %493 = vst [vmem:[%s1024_s2 + $0x48] sm:$0xff] %v477_v40  ;;  %v468_v45 = vadd.f32 %v389_v41, %v275_v37  ;;  %v476_v46 = vadd.f32 %v429_v42, %v283_v38 }
  0xfb   : > { %v693_v47 = vpop.f32.mrf.mxu0  ;;  %v705_v48 = vpop.f32.mrf.mxu1 }
  0xfc   : > { %484 = vst [vmem:[%s1024_s2] sm:$0xff] %v468_v45  ;;  %492 = vst [vmem:[%s1024_s2 + $0x40] sm:$0xff] %v476_v46  ;;  %v471_v51 = vadd.f32 %v693_v47, %v278_v43  ;;  %v479_v52 = vadd.f32 %v705_v48, %v286_v44 }
  0xfd   : > { %v399_v53 = vpop.f32.mrf.mxu0  ;;  %v439_v54 = vpop.f32.mrf.mxu1 }
  0xfe   : > { %487 = vst [vmem:[%s1024_s2 + $0x18] sm:$0xff] %v471_v51  ;;  %495 = vst [vmem:[%s1024_s2 + $0x58] sm:$0xff] %v479_v52  ;;  %v470_v57 = vadd.f32 %v399_v53, %v277_v49  ;;  %v478_v58 = vadd.f32 %v439_v54, %v285_v50 }
  0xff   : > { %v696_v59 = vpop.f32.mrf.mxu0  ;;  %v708_v60 = vpop.f32.mrf.mxu1 }
 0x100   : > { %486 = vst [vmem:[%s1024_s2 + $0x10] sm:$0xff] %v470_v57  ;;  %494 = vst [vmem:[%s1024_s2 + $0x50] sm:$0xff] %v478_v58  ;;  %v473_v63 = vadd.f32 %v696_v59, %v280_v55  ;;  %v481_v0 = vadd.f32 %v708_v60, %v288_v56 }
 0x101   : > { %v409_v1 = vpop.f32.mrf.mxu0  ;;  %v449_v2 = vpop.f32.mrf.mxu1 }
 0x102   : > { %489 = vst [vmem:[%s1024_s2 + $0x28] sm:$0xff] %v473_v63  ;;  %497 = vst [vmem:[%s1024_s2 + $0x68] sm:$0xff] %v481_v0  ;;  %v472_v5 = vadd.f32 %v409_v1, %v279_v61  ;;  %v480_v6 = vadd.f32 %v449_v2, %v287_v62 }
 0x103   : > { %v699_v7 = vpop.f32.mrf.mxu0  ;;  %v711_v8 = vpop.f32.mrf.mxu1 }
 0x104   : > { %488 = vst [vmem:[%s1024_s2 + $0x20] sm:$0xff] %v472_v5  ;;  %496 = vst [vmem:[%s1024_s2 + $0x60] sm:$0xff] %v480_v6  ;;  %v475_v11 = vadd.f32 %v699_v7, %v282_v3  ;;  %v483_v12 = vadd.f32 %v711_v8, %v290_v4 }
 0x105   : > { %v419_v13 = vpop.f32.mrf.mxu0  ;;  %v459_v14 = vpop.f32.mrf.mxu1 }
 0x106   : > { %491 = vst [vmem:[%s1024_s2 + $0x38] sm:$0xff] %v475_v11  ;;  %499 = vst [vmem:[%s1024_s2 + $0x78] sm:$0xff] %v483_v12  ;;  %v474_v15 = vadd.f32 %v419_v13, %v281_v9  ;;  %v482_v16 = vadd.f32 %v459_v14, %v289_v10 }
 0x108   : > { %490 = vst [vmem:[%s1024_s2 + $0x30] sm:$0xff] %v474_v15  ;;  %498 = vst [vmem:[%s1024_s2 + $0x70] sm:$0xff] %v482_v16 }
 0x109 PF: > { %s12_s11 = sadd.s32 1, %s791_s11   ;;  %s1025_s9 = smov %s787_s10 }
 0x10a   : > { %p9_p6 = scmp.ge.s32.totalorder %s12_s11, 5   ;;  %s1026_s10 = smov %s1028_s12 }
 0x10c   :  { %11 = sbr.rel (!%p9_p6) target bundleno = 2 (0x2), region = 65 }

</bundles_post_ra>
